<compile_context>
chip_gen: v5e
topology: v5e:2x2
jax: 0.10.0
libtpu: 0.0.40
codegen_flags: <defaults>
</compile_context>

<pallas_src>
import math
import functools

import jax
import jax.numpy as jnp
import numpy as np
from jax.experimental import pallas as pl
from jax.experimental.pallas import tpu as pltpu


def _attention_kernel(num_heads, c_hidden,
                      qx_ref, kvx_ref, bias_b_ref, bias_s_ref,
                      wqg_ref, wkv_ref, bg_ref, wo_ref, bo_ref,
                      out_ref):
    """One batch element per grid step.

    qx_ref:     (1, Lq, Cq) bf16          kvx_ref: (1, Lk, Ck) bf16
    bias_b_ref: (1, hb, qb, kb) bf16      per-batch (mask-style) bias, compact
    bias_s_ref: (1, hs, qs, ks) bf16      batch-shared (pair) bias, VMEM-resident
    wqg_ref:    (Cq, 2*H*C) bf16          [W_q * 1/sqrt(C) || W_g]
    wkv_ref:    (Ck, 2*H*C) bf16          [W_k || W_v]
    bg_ref:     (1, H*C) f32   wo_ref: (H*C, Cq) bf16   bo_ref: (1, Cq) f32
    out_ref:    (1, Lq, Cq)
    """
    H, C = num_heads, c_hidden
    hc = H * C
    hb = bias_b_ref.shape[1]   # 1 or H (static)
    hs = bias_s_ref.shape[1]   # 1 or H (static)

    qx = qx_ref[0]             # (Lq, Cq) bf16
    kvx = kvx_ref[0]           # (Lk, Ck) bf16

    # Fused projections: two wide-N bf16 MXU matmuls with f32 accumulation.
    qg = jnp.dot(qx, wqg_ref[...], preferred_element_type=jnp.float32)    # (Lq, 2hc)
    kv = jnp.dot(kvx, wkv_ref[...], preferred_element_type=jnp.float32)   # (Lk, 2hc)

    q = qg[:, :hc].astype(jnp.bfloat16)              # 1/sqrt(C) folded into W_q
    g = jax.nn.sigmoid(qg[:, hc:] + bg_ref[...])     # (Lq, hc) f32 gate
    k = kv[:, :hc].astype(jnp.bfloat16)
    v = kv[:, hc:].astype(jnp.bfloat16)

    # Per-head attention on register values (no head-major scratch relayout,
    # no masked partial stores, no VMEM round trips).  Score matmul contracts
    # on the last dim of both operands (the blessed transposed-RHS MXU path),
    # so no explicit K transpose is emitted.
    o_heads = []
    for h in range(H):
        sl = slice(h * C, (h + 1) * C)
        s = jnp.einsum("qc,kc->qk", q[:, sl], k[:, sl],
                       preferred_element_type=jnp.float32)                # (Lq, Lk) f32
        s = s + bias_s_ref[0, h if hs > 1 else 0, :, :].astype(jnp.float32)
        s = s + bias_b_ref[0, h if hb > 1 else 0, :, :].astype(jnp.float32)
        # Numerically stable softmax; PV uses UNNORMALIZED probabilities and
        # the 1/sum rescale is applied to the small (Lq, C) output instead of
        # the (Lq, Lk) score tensor.
        s = s - jnp.max(s, axis=-1, keepdims=True)
        p = jnp.exp(s)
        o_h = jnp.dot(p.astype(jnp.bfloat16), v[:, sl],
                      preferred_element_type=jnp.float32)                 # (Lq, C) f32
        o_h = o_h * pl.reciprocal(jnp.sum(p, axis=-1, keepdims=True), approx=True)
        o_heads.append(o_h)

    # Merge heads back to a lane-dense (Lq, H*C) slab, gate once, and do a
    # single K = H*C output-projection matmul.
    o_flat = jnp.concatenate(o_heads, axis=-1)                            # (Lq, hc) f32
    og = (o_flat * g).astype(jnp.bfloat16)
    out = jnp.dot(og, wo_ref[...], preferred_element_type=jnp.float32)    # (Lq, Cq)
    out_ref[0] = (out + bo_ref[...]).astype(out_ref.dtype)


def _compact_bias_sum(bias_list, lead):
    """Sum broadcast-compatible biases into their minimal joint shape (bf16)."""
    if not bias_list:
        return jnp.zeros((lead, 1, 1, 1), jnp.bfloat16)
    hd = max(b.shape[1] for b in bias_list)
    qd = max(b.shape[2] for b in bias_list)
    kd = max(b.shape[3] for b in bias_list)
    acc = jnp.zeros((lead, hd, qd, kd), jnp.float32)
    for b in bias_list:
        acc = acc + b.astype(jnp.float32)
    return acc.astype(jnp.bfloat16)


def attention_forward(q_x, kv_x, biases, params, *, num_heads, c_hidden):
    """Pallas-backed equivalent of Attention.forward (gating=True)."""
    if kv_x is None:
        kv_x = q_x
    if biases is None:
        biases = []

    B, Lq, Cq = q_x.shape
    _, Lk, Ck = kv_x.shape
    H, C = num_heads, c_hidden
    hc = H * C
    out_dtype = q_x.dtype

    # ---- bias handling: never materialize [B, H, Lq, Lk] in HBM ------------
    # (NOTE: a per-batch bias that genuinely carries full H and Lq dims would
    #  still expand to its own full shape; bf16 at least halves that cost.)
    shared = [b for b in biases if b.shape[0] == 1]     # batch-broadcast (pair) biases
    batched = [b for b in biases if b.shape[0] != 1]    # per-batch (mask) biases
    bias_shared = _compact_bias_sum(shared, 1)
    bias_batch = _compact_bias_sum(batched, B)
    _, hs, qs, ks = bias_shared.shape
    _, hb, qb, kb = bias_batch.shape

    # ---- weight prep: fold 1/sqrt(C) into W_q, fuse [W_q||W_g], [W_k||W_v] --
    scale = 1.0 / math.sqrt(C)
    wqg = jnp.concatenate([params["wq"] * scale, params["wg"]], axis=1).astype(jnp.bfloat16)
    wkv = jnp.concatenate([params["wk"], params["wv"]], axis=1).astype(jnp.bfloat16)
    wo = params["wo"].astype(jnp.bfloat16)
    bg = params["bg"].astype(jnp.float32)
    bo = params["bo"].astype(jnp.float32)

    # Stream activations in bf16 (halves per-step DMA); accumulate in f32.
    q_x_b = q_x.astype(jnp.bfloat16)
    kv_x_b = kv_x.astype(jnp.bfloat16)

    kernel = functools.partial(_attention_kernel, H, C)

    out = pl.pallas_call(
        kernel,
        out_shape=jax.ShapeDtypeStruct((B, Lq, Cq), out_dtype),
        grid=(B,),
        in_specs=[
            pl.BlockSpec((1, Lq, Cq), lambda b: (b, 0, 0)),          # q_x (bf16)
            pl.BlockSpec((1, Lk, Ck), lambda b: (b, 0, 0)),          # kv_x (bf16)
            pl.BlockSpec((1, hb, qb, kb), lambda b: (b, 0, 0, 0)),   # per-batch bias (bf16)
            pl.BlockSpec((1, hs, qs, ks), lambda b: (0, 0, 0, 0)),   # shared bias (resident)
            pl.BlockSpec((Cq, 2 * hc), lambda b: (0, 0)),            # [W_q*scale || W_g]
            pl.BlockSpec((Ck, 2 * hc), lambda b: (0, 0)),            # [W_k || W_v]
            pl.BlockSpec((1, hc), lambda b: (0, 0)),                 # b_g
            pl.BlockSpec((hc, Cq), lambda b: (0, 0)),                # W_o
            pl.BlockSpec((1, Cq), lambda b: (0, 0)),                 # b_o
        ],
        out_specs=pl.BlockSpec((1, Lq, Cq), lambda b: (b, 0, 0)),
        compiler_params=pltpu.CompilerParams(
            dimension_semantics=("parallel",),
            # <= 75% of v7x's 64 MiB/TC; comfortable on v5e/v6e (128 MiB).
            vmem_limit_bytes=48 * 1024 * 1024,
        ),
    )(q_x_b, kv_x_b, bias_batch, bias_shared, wqg, wkv, bg, wo, bo)
    return out


def attention_reference(q_x, kv_x, biases, params, *, num_heads, c_hidden):
    """Pure-JAX (f32) reference mirroring the PyTorch forward."""
    if kv_x is None:
        kv_x = q_x
    if biases is None:
        biases = []
    B, Lq, _ = q_x.shape
    _, Lk, _ = kv_x.shape
    H, C = num_heads, c_hidden

    q = (q_x @ params["wq"]).reshape(B, Lq, H, C).transpose(0, 2, 1, 3) / math.sqrt(C)
    k = (kv_x @ params["wk"]).reshape(B, Lk, H, C).transpose(0, 2, 1, 3)
    v = (kv_x @ params["wv"]).reshape(B, Lk, H, C).transpose(0, 2, 1, 3)

    a = jnp.einsum("bhqc,bhkc->bhqk", q, k)
    for b in biases:
        a = a + b
    a = jax.nn.softmax(a, axis=-1)
    o = jnp.einsum("bhqk,bhkc->bhqc", a, v).transpose(0, 2, 1, 3)   # (B, Lq, H, C)

    g = jax.nn.sigmoid(q_x @ params["wg"] + params["bg"][0]).reshape(B, Lq, H, C)
    o = (o * g).reshape(B, Lq, H * C)
    return o @ params["wo"] + params["bo"][0]


if __name__ == "__main__":
    # Small shapes consistent with the module's forward contract.
    B, Lq, Lk = 2, 8, 8
    c_q = c_k = c_v = 32
    c_hidden, num_heads = 16, 4
    hc = num_heads * c_hidden

    key = jax.random.PRNGKey(0)
    ks = jax.random.split(key, 10)

    # Deterministic synthetic parameters (AlphaFold's 'final'/'gating' inits
    # are zeros, which would make the output trivially zero; small random
    # weights exercise the full kernel path instead).
    params = {
        "wq": jax.random.normal(ks[0], (c_q, hc), jnp.float32) * 0.1,
        "wk": jax.random.normal(ks[1], (c_k, hc), jnp.float32) * 0.1,
        "wv": jax.random.normal(ks[2], (c_v, hc), jnp.float32) * 0.1,
        "wg": jax.random.normal(ks[3], (c_q, hc), jnp.float32) * 0.1,
        "bg": jax.random.normal(ks[4], (1, hc), jnp.float32) * 0.1,
        "wo": jax.random.normal(ks[5], (hc, c_q), jnp.float32) * 0.1,
        "bo": jax.random.normal(ks[6], (1, c_q), jnp.float32) * 0.1,
    }

    q_x = jax.random.normal(ks[7], (B, Lq, c_q), jnp.float32)
    kv_x = jax.random.normal(ks[8], (B, Lk, c_k), jnp.float32)

    # Two biases that broadcast to [B, H, Lq, Lk] (mask-style + pairwise).
    bk1, bk2 = jax.random.split(ks[9])
    bias_mask = jax.random.normal(bk1, (B, 1, 1, Lk), jnp.float32)
    bias_pair = jax.random.normal(bk2, (1, num_heads, Lq, Lk), jnp.float32)
    biases = [bias_mask, bias_pair]

    out = attention_forward(q_x, kv_x, biases, params,
                            num_heads=num_heads, c_hidden=c_hidden)
    out = jax.block_until_ready(out)

    ref = attention_reference(q_x, kv_x, biases, params,
                              num_heads=num_heads, c_hidden=c_hidden)
    # Tolerance reflects bf16 activations/biases/MXU inputs plus the EUP
    # approximate reciprocal in the kernel vs. the pure-f32 reference.
    np.testing.assert_allclose(np.asarray(out), np.asarray(ref),
                               rtol=3e-2, atol=3e-2)
    print("KERNEL_OK")
</pallas_src>

<mosaic_0001>
module attributes {stable_mosaic.version = 11 : i64} {
  func.func @_attention_kernel(%arg0: i32, %arg1: memref<1x8x32xbf16, #tpu.memory_space<vmem>>, %arg2: memref<1x8x32xbf16, #tpu.memory_space<vmem>>, %arg3: memref<1x1x1x8xbf16, #tpu.memory_space<vmem>>, %arg4: memref<1x4x8x8xbf16, #tpu.memory_space<vmem>>, %arg5: memref<32x128xbf16, #tpu.memory_space<vmem>>, %arg6: memref<32x128xbf16, #tpu.memory_space<vmem>>, %arg7: memref<1x64xf32, #tpu.memory_space<vmem>>, %arg8: memref<64x32xbf16, #tpu.memory_space<vmem>>, %arg9: memref<1x32xf32, #tpu.memory_space<vmem>>, %arg10: memref<1x8x32xf32, #tpu.memory_space<vmem>>) attributes {dimension_semantics = [#tpu.dimension_semantics<parallel>], iteration_bounds = array<i64: 2>, scalar_prefetch = 0 : i64, scratch_operands = 0 : i64, tpu.core_type = #tpu.core_type<tc>, window_params = [{transform_indices = @transform_0, window_bounds = array<i64: 1, 8, 32>}, {transform_indices = @transform_1, window_bounds = array<i64: 1, 8, 32>}, {transform_indices = @transform_2, window_bounds = array<i64: 1, 1, 1, 8>}, {pipeline_mode = #tpu.pipeline_mode<synchronous>, transform_indices = @transform_3, window_bounds = array<i64: 1, 4, 8, 8>}, {pipeline_mode = #tpu.pipeline_mode<synchronous>, transform_indices = @transform_4, window_bounds = array<i64: 32, 128>}, {pipeline_mode = #tpu.pipeline_mode<synchronous>, transform_indices = @transform_5, window_bounds = array<i64: 32, 128>}, {pipeline_mode = #tpu.pipeline_mode<synchronous>, transform_indices = @transform_6, window_bounds = array<i64: 1, 64>}, {pipeline_mode = #tpu.pipeline_mode<synchronous>, transform_indices = @transform_7, window_bounds = array<i64: 64, 32>}, {pipeline_mode = #tpu.pipeline_mode<synchronous>, transform_indices = @transform_8, window_bounds = array<i64: 1, 32>}, {transform_indices = @transform_9, window_bounds = array<i64: 1, 8, 32>}]} {
    %c0 = arith.constant 0 : index
    %c0_0 = arith.constant 0 : index
    %c0_1 = arith.constant 0 : index
    %0 = vector.load %arg1[%c0, %c0_0, %c0_1] : memref<1x8x32xbf16, #tpu.memory_space<vmem>>, vector<1x8x32xbf16>
    %1 = vector.shape_cast %0 : vector<1x8x32xbf16> to vector<8x32xbf16>
    %c0_2 = arith.constant 0 : index
    %c0_3 = arith.constant 0 : index
    %c0_4 = arith.constant 0 : index
    %2 = vector.load %arg2[%c0_2, %c0_3, %c0_4] : memref<1x8x32xbf16, #tpu.memory_space<vmem>>, vector<1x8x32xbf16>
    %3 = vector.shape_cast %2 : vector<1x8x32xbf16> to vector<8x32xbf16>
    %c0_5 = arith.constant 0 : index
    %c0_6 = arith.constant 0 : index
    %4 = vector.load %arg5[%c0_5, %c0_6] : memref<32x128xbf16, #tpu.memory_space<vmem>>, vector<32x128xbf16>
    %cst = arith.constant dense<0.000000e+00> : vector<8x128xf32>
    %5 = tpu.matmul %1, %4, %cst {dimension_numbers = #tpu.dot_dimension_numbers<[1], [0], [0], [1], [0, 0, 1, 1], [], []>} : vector<8x32xbf16>, vector<32x128xbf16>, vector<8x128xf32> -> vector<8x128xf32>
    %c0_7 = arith.constant 0 : index
    %c0_8 = arith.constant 0 : index
    %6 = vector.load %arg6[%c0_7, %c0_8] : memref<32x128xbf16, #tpu.memory_space<vmem>>, vector<32x128xbf16>
    %cst_9 = arith.constant dense<0.000000e+00> : vector<8x128xf32>
    %7 = tpu.matmul %3, %6, %cst_9 {dimension_numbers = #tpu.dot_dimension_numbers<[1], [0], [0], [1], [0, 0, 1, 1], [], []>} : vector<8x32xbf16>, vector<32x128xbf16>, vector<8x128xf32> -> vector<8x128xf32>
    %8 = vector.extract_strided_slice %5 {offsets = [0, 0], sizes = [8, 64], strides = [1, 1]} : vector<8x128xf32> to vector<8x64xf32>
    %9 = arith.truncf %8 : vector<8x64xf32> to vector<8x64xbf16>
    %10 = vector.extract_strided_slice %5 {offsets = [0, 64], sizes = [8, 64], strides = [1, 1]} : vector<8x128xf32> to vector<8x64xf32>
    %c0_10 = arith.constant 0 : index
    %c0_11 = arith.constant 0 : index
    %11 = vector.load %arg7[%c0_10, %c0_11] : memref<1x64xf32, #tpu.memory_space<vmem>>, vector<1x64xf32>
    %12 = vector.broadcast %11 : vector<1x64xf32> to vector<8x64xf32>
    %13 = arith.addf %10, %12 : vector<8x64xf32>
    %14 = arith.negf %13 : vector<8x64xf32>
    %15 = math.exp %14 : vector<8x64xf32>
    %cst_12 = arith.constant 1.000000e+00 : f32
    %16 = vector.broadcast %cst_12 : f32 to vector<8x64xf32>
    %17 = arith.addf %16, %15 : vector<8x64xf32>
    %18 = arith.divf %16, %17 : vector<8x64xf32>
    %19 = vector.extract_strided_slice %7 {offsets = [0, 0], sizes = [8, 64], strides = [1, 1]} : vector<8x128xf32> to vector<8x64xf32>
    %20 = arith.truncf %19 : vector<8x64xf32> to vector<8x64xbf16>
    %21 = vector.extract_strided_slice %7 {offsets = [0, 64], sizes = [8, 64], strides = [1, 1]} : vector<8x128xf32> to vector<8x64xf32>
    %22 = arith.truncf %21 : vector<8x64xf32> to vector<8x64xbf16>
    %23 = vector.extract_strided_slice %9 {offsets = [0, 0], sizes = [8, 16], strides = [1, 1]} : vector<8x64xbf16> to vector<8x16xbf16>
    %24 = vector.extract_strided_slice %20 {offsets = [0, 0], sizes = [8, 16], strides = [1, 1]} : vector<8x64xbf16> to vector<8x16xbf16>
    "tpu.trace_start"() <{level = 10 : i32, message = "qc,kc->qk"}> : () -> ()
    %cst_13 = arith.constant dense<0.000000e+00> : vector<8x8xf32>
    %25 = tpu.matmul %23, %24, %cst_13 {dimension_numbers = #tpu.dot_dimension_numbers<[1], [1], [0], [0], [0, 0, 1, 0], [], []>} : vector<8x16xbf16>, vector<8x16xbf16>, vector<8x8xf32> -> vector<8x8xf32>
    "tpu.trace_stop"() : () -> ()
    %c0_14 = arith.constant 0 : index
    %c0_15 = arith.constant 0 : index
    %c0_16 = arith.constant 0 : index
    %c0_17 = arith.constant 0 : index
    %26 = vector.load %arg4[%c0_14, %c0_15, %c0_16, %c0_17] : memref<1x4x8x8xbf16, #tpu.memory_space<vmem>>, vector<1x1x8x8xbf16>
    %27 = vector.shape_cast %26 : vector<1x1x8x8xbf16> to vector<8x8xbf16>
    %28 = arith.extf %27 : vector<8x8xbf16> to vector<8x8xf32>
    %29 = arith.addf %25, %28 : vector<8x8xf32>
    %c0_18 = arith.constant 0 : index
    %c0_19 = arith.constant 0 : index
    %c0_20 = arith.constant 0 : index
    %c0_21 = arith.constant 0 : index
    %30 = vector.load %arg3[%c0_18, %c0_19, %c0_20, %c0_21] : memref<1x1x1x8xbf16, #tpu.memory_space<vmem>>, vector<1x1x1x8xbf16>
    %31 = vector.shape_cast %30 : vector<1x1x1x8xbf16> to vector<1x8xbf16>
    %32 = arith.extf %31 : vector<1x8xbf16> to vector<1x8xf32>
    %33 = vector.broadcast %32 : vector<1x8xf32> to vector<8x8xf32>
    %34 = arith.addf %29, %33 : vector<8x8xf32>
    %cst_22 = arith.constant dense<0xFF800000> : vector<8xf32>
    %35 = vector.multi_reduction <maximumf>, %34, %cst_22 [1] : vector<8x8xf32> to vector<8xf32>
    %36 = vector.shape_cast %35 : vector<8xf32> to vector<8x1xf32>
    %37 = vector.broadcast %36 : vector<8x1xf32> to vector<8x8xf32>
    %38 = arith.subf %34, %37 : vector<8x8xf32>
    %39 = math.exp %38 : vector<8x8xf32>
    %40 = arith.truncf %39 : vector<8x8xf32> to vector<8x8xbf16>
    %41 = vector.extract_strided_slice %22 {offsets = [0, 0], sizes = [8, 16], strides = [1, 1]} : vector<8x64xbf16> to vector<8x16xbf16>
    %cst_23 = arith.constant dense<0.000000e+00> : vector<8x16xf32>
    %42 = tpu.matmul %40, %41, %cst_23 {dimension_numbers = #tpu.dot_dimension_numbers<[1], [0], [0], [1], [0, 0, 1, 1], [], []>} : vector<8x8xbf16>, vector<8x16xbf16>, vector<8x16xf32> -> vector<8x16xf32>
    %cst_24 = arith.constant dense<0.000000e+00> : vector<8xf32>
    %43 = vector.multi_reduction <add>, %39, %cst_24 [1] : vector<8x8xf32> to vector<8xf32>
    %44 = vector.shape_cast %43 : vector<8xf32> to vector<8x1xf32>
    %45 = tpu.reciprocal %44 {approx = true} : vector<8x1xf32> -> vector<8x1xf32>
    %46 = vector.broadcast %45 : vector<8x1xf32> to vector<8x16xf32>
    %47 = arith.mulf %42, %46 : vector<8x16xf32>
    %48 = vector.extract_strided_slice %9 {offsets = [0, 16], sizes = [8, 16], strides = [1, 1]} : vector<8x64xbf16> to vector<8x16xbf16>
    %49 = vector.extract_strided_slice %20 {offsets = [0, 16], sizes = [8, 16], strides = [1, 1]} : vector<8x64xbf16> to vector<8x16xbf16>
    "tpu.trace_start"() <{level = 10 : i32, message = "qc,kc->qk"}> : () -> ()
    %cst_25 = arith.constant dense<0.000000e+00> : vector<8x8xf32>
    %50 = tpu.matmul %48, %49, %cst_25 {dimension_numbers = #tpu.dot_dimension_numbers<[1], [1], [0], [0], [0, 0, 1, 0], [], []>} : vector<8x16xbf16>, vector<8x16xbf16>, vector<8x8xf32> -> vector<8x8xf32>
    "tpu.trace_stop"() : () -> ()
    %c0_26 = arith.constant 0 : index
    %c1 = arith.constant 1 : index
    %c0_27 = arith.constant 0 : index
    %c0_28 = arith.constant 0 : index
    %51 = vector.load %arg4[%c0_26, %c1, %c0_27, %c0_28] : memref<1x4x8x8xbf16, #tpu.memory_space<vmem>>, vector<1x1x8x8xbf16>
    %52 = vector.shape_cast %51 : vector<1x1x8x8xbf16> to vector<8x8xbf16>
    %53 = arith.extf %52 : vector<8x8xbf16> to vector<8x8xf32>
    %54 = arith.addf %50, %53 : vector<8x8xf32>
    %c0_29 = arith.constant 0 : index
    %c0_30 = arith.constant 0 : index
    %c0_31 = arith.constant 0 : index
    %c0_32 = arith.constant 0 : index
    %55 = vector.load %arg3[%c0_29, %c0_30, %c0_31, %c0_32] : memref<1x1x1x8xbf16, #tpu.memory_space<vmem>>, vector<1x1x1x8xbf16>
    %56 = vector.shape_cast %55 : vector<1x1x1x8xbf16> to vector<1x8xbf16>
    %57 = arith.extf %56 : vector<1x8xbf16> to vector<1x8xf32>
    %58 = vector.broadcast %57 : vector<1x8xf32> to vector<8x8xf32>
    %59 = arith.addf %54, %58 : vector<8x8xf32>
    %cst_33 = arith.constant dense<0xFF800000> : vector<8xf32>
    %60 = vector.multi_reduction <maximumf>, %59, %cst_33 [1] : vector<8x8xf32> to vector<8xf32>
    %61 = vector.shape_cast %60 : vector<8xf32> to vector<8x1xf32>
    %62 = vector.broadcast %61 : vector<8x1xf32> to vector<8x8xf32>
    %63 = arith.subf %59, %62 : vector<8x8xf32>
    %64 = math.exp %63 : vector<8x8xf32>
    %65 = arith.truncf %64 : vector<8x8xf32> to vector<8x8xbf16>
    %66 = vector.extract_strided_slice %22 {offsets = [0, 16], sizes = [8, 16], strides = [1, 1]} : vector<8x64xbf16> to vector<8x16xbf16>
    %cst_34 = arith.constant dense<0.000000e+00> : vector<8x16xf32>
    %67 = tpu.matmul %65, %66, %cst_34 {dimension_numbers = #tpu.dot_dimension_numbers<[1], [0], [0], [1], [0, 0, 1, 1], [], []>} : vector<8x8xbf16>, vector<8x16xbf16>, vector<8x16xf32> -> vector<8x16xf32>
    %cst_35 = arith.constant dense<0.000000e+00> : vector<8xf32>
    %68 = vector.multi_reduction <add>, %64, %cst_35 [1] : vector<8x8xf32> to vector<8xf32>
    %69 = vector.shape_cast %68 : vector<8xf32> to vector<8x1xf32>
    %70 = tpu.reciprocal %69 {approx = true} : vector<8x1xf32> -> vector<8x1xf32>
    %71 = vector.broadcast %70 : vector<8x1xf32> to vector<8x16xf32>
    %72 = arith.mulf %67, %71 : vector<8x16xf32>
    %73 = vector.extract_strided_slice %9 {offsets = [0, 32], sizes = [8, 16], strides = [1, 1]} : vector<8x64xbf16> to vector<8x16xbf16>
    %74 = vector.extract_strided_slice %20 {offsets = [0, 32], sizes = [8, 16], strides = [1, 1]} : vector<8x64xbf16> to vector<8x16xbf16>
    "tpu.trace_start"() <{level = 10 : i32, message = "qc,kc->qk"}> : () -> ()
    %cst_36 = arith.constant dense<0.000000e+00> : vector<8x8xf32>
    %75 = tpu.matmul %73, %74, %cst_36 {dimension_numbers = #tpu.dot_dimension_numbers<[1], [1], [0], [0], [0, 0, 1, 0], [], []>} : vector<8x16xbf16>, vector<8x16xbf16>, vector<8x8xf32> -> vector<8x8xf32>
    "tpu.trace_stop"() : () -> ()
    %c0_37 = arith.constant 0 : index
    %c2 = arith.constant 2 : index
    %c0_38 = arith.constant 0 : index
    %c0_39 = arith.constant 0 : index
    %76 = vector.load %arg4[%c0_37, %c2, %c0_38, %c0_39] : memref<1x4x8x8xbf16, #tpu.memory_space<vmem>>, vector<1x1x8x8xbf16>
    %77 = vector.shape_cast %76 : vector<1x1x8x8xbf16> to vector<8x8xbf16>
    %78 = arith.extf %77 : vector<8x8xbf16> to vector<8x8xf32>
    %79 = arith.addf %75, %78 : vector<8x8xf32>
    %c0_40 = arith.constant 0 : index
    %c0_41 = arith.constant 0 : index
    %c0_42 = arith.constant 0 : index
    %c0_43 = arith.constant 0 : index
    %80 = vector.load %arg3[%c0_40, %c0_41, %c0_42, %c0_43] : memref<1x1x1x8xbf16, #tpu.memory_space<vmem>>, vector<1x1x1x8xbf16>
    %81 = vector.shape_cast %80 : vector<1x1x1x8xbf16> to vector<1x8xbf16>
    %82 = arith.extf %81 : vector<1x8xbf16> to vector<1x8xf32>
    %83 = vector.broadcast %82 : vector<1x8xf32> to vector<8x8xf32>
    %84 = arith.addf %79, %83 : vector<8x8xf32>
    %cst_44 = arith.constant dense<0xFF800000> : vector<8xf32>
    %85 = vector.multi_reduction <maximumf>, %84, %cst_44 [1] : vector<8x8xf32> to vector<8xf32>
    %86 = vector.shape_cast %85 : vector<8xf32> to vector<8x1xf32>
    %87 = vector.broadcast %86 : vector<8x1xf32> to vector<8x8xf32>
    %88 = arith.subf %84, %87 : vector<8x8xf32>
    %89 = math.exp %88 : vector<8x8xf32>
    %90 = arith.truncf %89 : vector<8x8xf32> to vector<8x8xbf16>
    %91 = vector.extract_strided_slice %22 {offsets = [0, 32], sizes = [8, 16], strides = [1, 1]} : vector<8x64xbf16> to vector<8x16xbf16>
    %cst_45 = arith.constant dense<0.000000e+00> : vector<8x16xf32>
    %92 = tpu.matmul %90, %91, %cst_45 {dimension_numbers = #tpu.dot_dimension_numbers<[1], [0], [0], [1], [0, 0, 1, 1], [], []>} : vector<8x8xbf16>, vector<8x16xbf16>, vector<8x16xf32> -> vector<8x16xf32>
    %cst_46 = arith.constant dense<0.000000e+00> : vector<8xf32>
    %93 = vector.multi_reduction <add>, %89, %cst_46 [1] : vector<8x8xf32> to vector<8xf32>
    %94 = vector.shape_cast %93 : vector<8xf32> to vector<8x1xf32>
    %95 = tpu.reciprocal %94 {approx = true} : vector<8x1xf32> -> vector<8x1xf32>
    %96 = vector.broadcast %95 : vector<8x1xf32> to vector<8x16xf32>
    %97 = arith.mulf %92, %96 : vector<8x16xf32>
    %98 = vector.extract_strided_slice %9 {offsets = [0, 48], sizes = [8, 16], strides = [1, 1]} : vector<8x64xbf16> to vector<8x16xbf16>
    %99 = vector.extract_strided_slice %20 {offsets = [0, 48], sizes = [8, 16], strides = [1, 1]} : vector<8x64xbf16> to vector<8x16xbf16>
    "tpu.trace_start"() <{level = 10 : i32, message = "qc,kc->qk"}> : () -> ()
    %cst_47 = arith.constant dense<0.000000e+00> : vector<8x8xf32>
    %100 = tpu.matmul %98, %99, %cst_47 {dimension_numbers = #tpu.dot_dimension_numbers<[1], [1], [0], [0], [0, 0, 1, 0], [], []>} : vector<8x16xbf16>, vector<8x16xbf16>, vector<8x8xf32> -> vector<8x8xf32>
    "tpu.trace_stop"() : () -> ()
    %c0_48 = arith.constant 0 : index
    %c3 = arith.constant 3 : index
    %c0_49 = arith.constant 0 : index
    %c0_50 = arith.constant 0 : index
    %101 = vector.load %arg4[%c0_48, %c3, %c0_49, %c0_50] : memref<1x4x8x8xbf16, #tpu.memory_space<vmem>>, vector<1x1x8x8xbf16>
    %102 = vector.shape_cast %101 : vector<1x1x8x8xbf16> to vector<8x8xbf16>
    %103 = arith.extf %102 : vector<8x8xbf16> to vector<8x8xf32>
    %104 = arith.addf %100, %103 : vector<8x8xf32>
    %c0_51 = arith.constant 0 : index
    %c0_52 = arith.constant 0 : index
    %c0_53 = arith.constant 0 : index
    %c0_54 = arith.constant 0 : index
    %105 = vector.load %arg3[%c0_51, %c0_52, %c0_53, %c0_54] : memref<1x1x1x8xbf16, #tpu.memory_space<vmem>>, vector<1x1x1x8xbf16>
    %106 = vector.shape_cast %105 : vector<1x1x1x8xbf16> to vector<1x8xbf16>
    %107 = arith.extf %106 : vector<1x8xbf16> to vector<1x8xf32>
    %108 = vector.broadcast %107 : vector<1x8xf32> to vector<8x8xf32>
    %109 = arith.addf %104, %108 : vector<8x8xf32>
    %cst_55 = arith.constant dense<0xFF800000> : vector<8xf32>
    %110 = vector.multi_reduction <maximumf>, %109, %cst_55 [1] : vector<8x8xf32> to vector<8xf32>
    %111 = vector.shape_cast %110 : vector<8xf32> to vector<8x1xf32>
    %112 = vector.broadcast %111 : vector<8x1xf32> to vector<8x8xf32>
    %113 = arith.subf %109, %112 : vector<8x8xf32>
    %114 = math.exp %113 : vector<8x8xf32>
    %115 = arith.truncf %114 : vector<8x8xf32> to vector<8x8xbf16>
    %116 = vector.extract_strided_slice %22 {offsets = [0, 48], sizes = [8, 16], strides = [1, 1]} : vector<8x64xbf16> to vector<8x16xbf16>
    %cst_56 = arith.constant dense<0.000000e+00> : vector<8x16xf32>
    %117 = tpu.matmul %115, %116, %cst_56 {dimension_numbers = #tpu.dot_dimension_numbers<[1], [0], [0], [1], [0, 0, 1, 1], [], []>} : vector<8x8xbf16>, vector<8x16xbf16>, vector<8x16xf32> -> vector<8x16xf32>
    %cst_57 = arith.constant dense<0.000000e+00> : vector<8xf32>
    %118 = vector.multi_reduction <add>, %114, %cst_57 [1] : vector<8x8xf32> to vector<8xf32>
    %119 = vector.shape_cast %118 : vector<8xf32> to vector<8x1xf32>
    %120 = tpu.reciprocal %119 {approx = true} : vector<8x1xf32> -> vector<8x1xf32>
    %121 = vector.broadcast %120 : vector<8x1xf32> to vector<8x16xf32>
    %122 = arith.mulf %117, %121 : vector<8x16xf32>
    %123 = tpu.concatenate %47, %72, %97, %122 in 1 : vector<8x16xf32>, vector<8x16xf32>, vector<8x16xf32>, vector<8x16xf32> -> vector<8x64xf32>
    %124 = arith.mulf %123, %18 : vector<8x64xf32>
    %125 = arith.truncf %124 : vector<8x64xf32> to vector<8x64xbf16>
    %c0_58 = arith.constant 0 : index
    %c0_59 = arith.constant 0 : index
    %126 = vector.load %arg8[%c0_58, %c0_59] : memref<64x32xbf16, #tpu.memory_space<vmem>>, vector<64x32xbf16>
    %cst_60 = arith.constant dense<0.000000e+00> : vector<8x32xf32>
    %127 = tpu.matmul %125, %126, %cst_60 {dimension_numbers = #tpu.dot_dimension_numbers<[1], [0], [0], [1], [0, 0, 1, 1], [], []>} : vector<8x64xbf16>, vector<64x32xbf16>, vector<8x32xf32> -> vector<8x32xf32>
    %c0_61 = arith.constant 0 : index
    %c0_62 = arith.constant 0 : index
    %128 = vector.load %arg9[%c0_61, %c0_62] : memref<1x32xf32, #tpu.memory_space<vmem>>, vector<1x32xf32>
    %129 = vector.broadcast %128 : vector<1x32xf32> to vector<8x32xf32>
    %130 = arith.addf %127, %129 : vector<8x32xf32>
    %c0_63 = arith.constant 0 : index
    %c0_64 = arith.constant 0 : index
    %c0_65 = arith.constant 0 : index
    %131 = vector.load %arg10[%c0_63, %c0_64, %c0_65] : memref<1x8x32xf32, #tpu.memory_space<vmem>>, vector<1x8x32xf32>
    %132 = vector.shape_cast %131 : vector<1x8x32xf32> to vector<8x32xf32>
    %133 = vector.shape_cast %130 : vector<8x32xf32> to vector<1x8x32xf32>
    tpu.vector_store %arg10[%c0_63, %c0_64, %c0_65], %133 {strides = array<i32>} : memref<1x8x32xf32, #tpu.memory_space<vmem>>, vector<1x8x32xf32>,
    return
  }
  func.func @transform_0(%arg0: i32) -> (i32, i32, i32) {
    %c0_i32 = arith.constant 0 : i32
    %c0_i32_0 = arith.constant 0 : i32
    %c0_i32_1 = arith.constant 0 : i32
    return %arg0, %c0_i32, %c0_i32_0 : i32, i32, i32
  }
  func.func @transform_1(%arg0: i32) -> (i32, i32, i32) {
    %c0_i32 = arith.constant 0 : i32
    %c0_i32_0 = arith.constant 0 : i32
    %c0_i32_1 = arith.constant 0 : i32
    return %arg0, %c0_i32, %c0_i32_0 : i32, i32, i32
  }
  func.func @transform_2(%arg0: i32) -> (i32, i32, i32, i32) {
    %c0_i32 = arith.constant 0 : i32
    %c0_i32_0 = arith.constant 0 : i32
    %c0_i32_1 = arith.constant 0 : i32
    %c0_i32_2 = arith.constant 0 : i32
    return %arg0, %c0_i32, %c0_i32_0, %c0_i32_1 : i32, i32, i32, i32
  }
  func.func @transform_3(%arg0: i32) -> (i32, i32, i32, i32) {
    %c0_i32 = arith.constant 0 : i32
    %c0_i32_0 = arith.constant 0 : i32
    %c0_i32_1 = arith.constant 0 : i32
    %c0_i32_2 = arith.constant 0 : i32
    %c0_i32_3 = arith.constant 0 : i32
    return %c0_i32, %c0_i32_0, %c0_i32_1, %c0_i32_2 : i32, i32, i32, i32
  }
  func.func @transform_4(%arg0: i32) -> (i32, i32) {
    %c0_i32 = arith.constant 0 : i32
    %c0_i32_0 = arith.constant 0 : i32
    %c0_i32_1 = arith.constant 0 : i32
    return %c0_i32, %c0_i32_0 : i32, i32
  }
  func.func @transform_5(%arg0: i32) -> (i32, i32) {
    %c0_i32 = arith.constant 0 : i32
    %c0_i32_0 = arith.constant 0 : i32
    %c0_i32_1 = arith.constant 0 : i32
    return %c0_i32, %c0_i32_0 : i32, i32
  }
  func.func @transform_6(%arg0: i32) -> (i32, i32) {
    %c0_i32 = arith.constant 0 : i32
    %c0_i32_0 = arith.constant 0 : i32
    %c0_i32_1 = arith.constant 0 : i32
    return %c0_i32, %c0_i32_0 : i32, i32
  }
  func.func @transform_7(%arg0: i32) -> (i32, i32) {
    %c0_i32 = arith.constant 0 : i32
    %c0_i32_0 = arith.constant 0 : i32
    %c0_i32_1 = arith.constant 0 : i32
    return %c0_i32, %c0_i32_0 : i32, i32
  }
  func.func @transform_8(%arg0: i32) -> (i32, i32) {
    %c0_i32 = arith.constant 0 : i32
    %c0_i32_0 = arith.constant 0 : i32
    %c0_i32_1 = arith.constant 0 : i32
    return %c0_i32, %c0_i32_0 : i32, i32
  }
  func.func @transform_9(%arg0: i32) -> (i32, i32, i32) {
    %c0_i32 = arith.constant 0 : i32
    %c0_i32_0 = arith.constant 0 : i32
    %c0_i32_1 = arith.constant 0 : i32
    return %arg0, %c0_i32, %c0_i32_0 : i32, i32, i32
  }
}

</mosaic_0001>

<bundles_post_ra>
// kernel: tpu_custom_call.1
= control target key start
LH: loop header
LB: loop body
LE: loop exit
PB: predicated region body
PF: predicated region fallthrough
CT: control target
= control target key end

     0   :  { %s1560_s0 = inlined_call_operand.hbm [shape: bf16[2,8,32], index: 0, kind: input, shape index: {}]   ;;  %s1561_s1 = inlined_call_operand.hbm [shape: bf16[2,8,32], index: 1, kind: input, shape index: {}]   ;;  %s1562_s2 = inlined_call_operand.vmem [shape: bf16[2,1,1,8], index: 2, kind: input, shape index: {}]   ;;  %s1563_s3 = inlined_call_operand.vmem [shape: bf16[1,4,8,8], index: 3, kind: input, shape index: {}]   ;;  %s1564_s4 = inlined_call_operand.vmem [shape: bf16[32,128], index: 4, kind: input, shape index: {}]   ;;  %s1565_s5 = inlined_call_operand.vmem [shape: bf16[32,128], index: 5, kind: input, shape index: {}]   ;;  %s1566_s6 = inlined_call_operand.vmem [shape: f32[1,64], index: 6, kind: input, shape index: {}]   ;;  %s1567_s7 = inlined_call_operand.vmem [shape: bf16[64,32], index: 7, kind: input, shape index: {}]   ;;  %s1568_s8 = inlined_call_operand.vmem [shape: f32[1,32], index: 8, kind: input, shape index: {}]   ;;  %s1569_s9 = inlined_call_operand.hbm [shape: f32[2,8,32], index: 9, kind: output, shape index: {}]  }
   0x1   :  { %1575 = sst [smem:[#allocation16_spill]] %s1560_s0 }
   0x2   :  { %14 = vsyncpa [#allocation3], 0 }
   0x3   :  { %16 = vsyncpa [#allocation3 + $0x1], 0 }
   0x4   :  { %17 = vsyncpa [#allocation6], 0 }
   0x5   :  { %19 = vsyncpa [#allocation6 + $0x1], 0 }
   0x6   :  { %20 = vsyncpa [#allocation4], 0 }
   0x7   :  { %22 = vsyncpa [#allocation4 + $0x1], 0  ;;  %s1288_s30 = smov 0   ;;  %s1290_s10 = smov 0  }
   0x8   :  { %s1292_s11 = smov 0   ;;  %s1294_s12 = smov 0  }
   0x9 LB: > { %1576 = sst [smem:[#allocation11_spill]] %s1217_s30  ;;  %s1309_s13 = sadd.s32 4294967295, %s1229_s12   ;;  %s1229_s12 = sphi %s1294_s12, %s1591_s12   ;;  %s1225_s11 = sphi %s1292_s11, %s1593_s11   ;;  %s1221_s10 = sphi %s1290_s10, %s1595_s10   ;;  %s1217_s30 = sphi %s1288_s30, %s1594_s30  }
   0xa   : > { %1577 = sst [smem:[#allocation12_spill]] %s1225_s11  ;;  %s949_s14 = sadd.s32 4294967294, %s1229_s12  }
   0xb   : > { %s1313_s15 = sadd.s32 1, %s1229_s12   ;;  %s35_s16 = sadd.s32 1, %s1225_s11 }
   0xc   : > { %1578 = sst [smem:[#allocation13_spill]] %s1313_s15  ;;  %s32_s17 = ssub.s32 %s1229_s12, %s1313_s15 }
   0xd   : > { %p42_p0 = scmp.ne.s32.totalorder %s1225_s11, %s1221_s10  ;;  %p33_p1 = scmp.eq.s32.totalorder %s32_s17, 0 }
   0xe   : > { %p43_p2 = scmp.eq.s32.totalorder %s1229_s12, 0  ;;  %p48_p3 = scmp.ne.s32.totalorder %s1221_s10, %s1217_s30 }
   0xf   : > { %p49_p4 = scmp.eq.s32.totalorder %s1309_s13, 0  ;;  %p250_p7 = scmp.eq.s32.totalorder %s1309_s13, 1 }
  0x10   : > { %s1325_s18 = scalar_select %p33_p1, %s1225_s11, %s35_s16  }
  0x11   : > { %p1327_p5 = por %p43_p2, %p42_p0  ;;  %p1331_p6 = por %p49_p4, %p48_p3 }
  0x12   : > { %1579 = sst [smem:[#allocation14_spill]] %s1325_s18  ;;  %p256_p8 = scmp.eq.s32.totalorder %s949_s14, 1 }
  0x13   : > { %p1036_p10 = scmp.lt.s32.totalorder %s1229_s12, 2  ;;  %p1338_p11 = por %p250_p7, %p42_p0 }
  0x14   : > { %p1342_p12 = por %p256_p8, %p48_p3  ;;  %s1347_s23 = sand.u32 1, %s1225_s11  }
  0x15   : > { %s953_s24 = sshll.u32 %s1229_s12, 2  ;;  %s952_s25 = sshll.u32 %s1347_s23, 2 }
  0x16   : > { %s1583_s22 = scalar_select %p1342_p12, 1, 0 }
  0x17   : > { %s1585_s0 = sld [smem:[#allocation16_spill]]  ;;  %s298_s14 = scalar_lea.vmem [#allocation2], %s952_s25 }
  0x18   : > { %1584 = sst [smem:[#allocation15_spill]] %s1583_s22  ;;  %s306_s16 = sshll.u32 %s298_s14, 4  ;;  %s307_s16 = int_to_ptr.vmem [resolvable:$true] %s306_s16 }
  0x19   : > { %p1356_p13 = pnand %p1036_p10, %p1327_p5  ;;  %p956_p0 = scmp.ge.s32.totalorder %s1229_s12, 1 }
  0x1a   : > { %p336_p1 = scmp.lt.s32.totalorder %s1229_s12, 3  ;;  %s295_s18 = scalar_lea.sflag [#allocation3], %s1347_s23 }
  0x1b   : > { %p1103_p3 = pneg %p1356_p13 }
  0x1d   : > { %s302_s28 = scalar_lea.hbm %s1585_s0, %s953_s24  ;;  %s1106_s27 = scalar_lea.hbm %s1585_s0, 8 }
  0x1e   : > { %s304_s29 = sshll.u32 %s302_s28, 4  ;;  %s305_s29 = int_to_ptr.hbm [resolvable:$true] %s304_s29 }
  0x1f   : > { %s1099_s11 = sshra.s32 %s305_s29, 4  ;;  %s1100_s11 = int_to_ptr.hbm [resolvable:$true] %s1099_s11 }
  0x20   : > { %s1101_s15 = scalar_lea.hbm %s1100_s11, 4  ;;  %p1107_p5 = scmp.lt.s32.totalorder %s1100_s11, %s1585_s0 }
  0x21   : > { %p1102_p2 = scmp.ne.s32.totalorder %s1100_s11, %s1101_s15  ;;  %p1108_p8 = scmp.lt.s32.totalorder %s1106_s27, %s1101_s15 }
  0x23   : > { %p1104_p4 = pnand %p1103_p3, %p1102_p2  ;;  %p1109_p10 = por %p1108_p8, %p1107_p5 }
  0x25   : > { %p1105_p7 = pneg %p1104_p4 }
  0x27   : > { %p1110_p9 = pnand %p1109_p10, %p1105_p7 }
  0x29   : > { %1113 = shalt.err (!%p1110_p9)
}
  0x2a   : > { %1028 = dma.hbm_to_vmem [thread:$0]  (!%p1356_p13), %s305_s29, 64, %s307_s16, %s295_s18  }
  0x2b   : > { %p1380_p2 = pnand %p956_p0, %p336_p1  ;;  %s321_s11 = scalar_lea.hbm %s1561_s1, %s953_s24 }
  0x2c   : > { %s323_s15 = sshll.u32 %s321_s11, 4  ;;  %s317_s27 = scalar_lea.vmem [#allocation5], %s952_s25  ;;  %s324_s15 = int_to_ptr.hbm [resolvable:$true] %s323_s15 }
  0x2d   : > { %s325_s14 = sshll.u32 %s317_s27, 4  ;;  %s314_s0 = scalar_lea.sflag [#allocation6], %s1347_s23  ;;  %s326_s14 = int_to_ptr.vmem [resolvable:$true] %s325_s14 }
  0x2e   : > { %s1129_s22 = sshra.s32 %s324_s15, 4  ;;  %s1136_s16 = scalar_lea.hbm %s1561_s1, 8  ;;  %s1130_s22 = int_to_ptr.hbm [resolvable:$true] %s1129_s22 }
  0x2f   : > { %s1131_s30 = scalar_lea.hbm %s1130_s22, 4  ;;  %p1137_p4 = scmp.lt.s32.totalorder %s1130_s22, %s1561_s1 }
  0x30   : > { %p1132_p9 = scmp.ne.s32.totalorder %s1130_s22, %s1131_s30  ;;  %p1138_p7 = scmp.lt.s32.totalorder %s1136_s16, %s1131_s30 }
  0x32   : > { %p1134_p0 = pnand %p1132_p9, %p1103_p3  ;;  %p1139_p5 = por %p1138_p7, %p1137_p4 }
  0x34   : > { %p1135_p1 = pneg %p1134_p0 }
  0x36   : > { %p1140_p8 = pnand %p1139_p5, %p1135_p1 }
  0x38   : > { %1143 = shalt.err (!%p1140_p8)
}
  0x39   : > { %1031 = dma.hbm_to_vmem [thread:$0]  (!%p1356_p13), %s324_s15, 64, %s326_s14, %s314_s0  }
  0x3a   : > { %340 = sbr.rel (%p1380_p2) target bundleno = 1167 (0x48f), region = 56  ;;  %s1402_s23 = sand.u32 (!%p1380_p2), 1, %s1221_s10  }
  0x3b   : > { %s957_s25 = sshll.u32 (!%p1380_p2), %s1402_s23, 2  ;;  %s343_s28 = scalar_lea.sflag (!%p1380_p2), [#allocation3], %s1402_s23 }
  0x3c   : > { %s346_s11 = scalar_lea.vmem (!%p1380_p2), [#allocation2], %s957_s25 }
  0x3f   : > { %1204 = dma.done.wait (%p1331_p6), %s343_s28, 64  }
  0x40   : > { %1206 = vsyncadd (%p1331_p6), %s343_s28, 4294967232  ;;  %s353_s0 = scalar_lea.sflag [#allocation6], %s1402_s23  ;;  %s356_s30 = scalar_lea.vmem [#allocation5], %s957_s25 }
  0x41   : > { %1208 = dma.done.wait (%p1331_p6), %s353_s0, 64  }
  0x42   : > { %1210 = vsyncadd (%p1331_p6), %s353_s0, 4294967232  ;;  %v1012_v0 = vld [vmem:[%s1564_s4 + $0x8] sm:$0xff]  ;;  %v1011_v2 = vld [vmem:[%s1564_s4] sm:$0xff]  ;;  %vm422_vm0 = vcmask 261120   ;;  %vm501_vm1 = vcmask 130048   ;;  %s1231_s20 = smov 96  }
  0x43   : > { %v1014_v1 = vld [vmem:[%s1565_s5 + $0x8] sm:$0xff]  ;;  %432 = vmatpush.bf16.msra.mxu0 %v1012_v0  ;;  %v1013_v3 = vld [vmem:[%s1565_s5] sm:$0xff]  ;;  %s1232_s16 = smov 112   ;;  %s1233_s26 = smov 80   ;;  %vm525_vm2 = vcmask 64512   ;;  %vm541_vm3 = vcmask 1043456  }
  0x44   : > { %464 = vmatpush.bf16.msra.mxu1 %v1014_v1  ;;  %v404_v4 = vld [vmem:[%s346_s11] sm:$0xf]  ;;  %v405_v5 = vld [vmem:[%s356_s30] sm:$0xf]  ;;  %p400_p6 = scmp.lt.s32.totalorder %s1309_s13, 1  ;;  %s1234_s22 = smov 64  }
  0x45   : > { %v1452_v22 = vld [vmem:[%s1563_s3] sm:$0xff]   ;;  %s1235_s17 = smov 48   ;;  %v984_v33 = vld [vmem:[%s1563_s3 + $0x8] sm:$0xff]   ;;  %s1236_s27 = smov 32   ;;  %vm769_vm8 = vcmask 392192   ;;  %vm813_vm9 = vcmask 523264  }
  0x46   : > { %s401_s24 = scalar_select %p400_p6, %s1309_s13, 1  ;;  %v500_v25 = vunpack.c.l.bf16 %v1452_v22  ;;  %v631_v35 = vunpack.c.l.bf16 %v984_v33 }
  0x47   : > { %433 = vmatpush.bf16.msra.mxu0 %v1011_v2  ;;  %v565_v2 = vunpack.c.h.bf16 %v1452_v22  ;;  %s1237_s14 = smov 16   ;;  %s1008_s30 = sshll.u32 %s1309_s13, 3 }
  0x48   : > { %465 = vmatpush.bf16.msra.mxu1 %v1013_v3  ;;  %s1446_s11 = scalar_lea.vmem %s1562_s2, %s401_s24  ;;  %s842_s15 = scalar_lea.hbm %s1569_s9, %s1008_s30 }
  0x49   : > { %v521_v21 = vld [vmem:[%s1446_s11] sm:$0x1]  ;;  %s832_s13 = scalar_lea.sflag [#allocation4], %s1402_s23  ;;  %s1179_s28 = scalar_lea.hbm %s1569_s9, 16 }
  0x4a   : > { %968 = vmatmul.msk.bf16.vlgmr.msra.gmra.mxu0 %vm422_vm0, %v404_v4  ;;  %v522_v24 = vunpack.c.l.bf16 %v521_v21  ;;  %v655_v32 = vld [vmem:[%s1446_s11] sm:$0x1] }
  0x4b   : > { %977 = vmatmul.msk.bf16.vlgmr.msra.gmra.mxu1 %vm422_vm0, %v405_v5  ;;  %v656_v34 = vunpack.c.l.bf16 %v655_v32  ;;  %v592_v0 = vld [vmem:[%s1446_s11] sm:$0x1] }
  0x4c   : > { %v523_v26 = vperm.slane %v522_v24, 0  ;;  %v593_v1 = vunpack.c.l.bf16 %v592_v0 }
  0x4d   : > { %v657_v36 = vperm.slane %v656_v34, 0 }
  0x4e   : > { %v594_v3 = vperm.slane %v593_v1, 0 }
  0xc7   : > { %v1429_v6 = vpop.f32.mrf.mxu0 }
  0xc8   : > { %v467_v7 = vpop.f32.mrf.mxu1  ;;  %v471_v9 = vpack.c.bf16 %v1429_v6, %v1429_v6 }
  0xc9   : > { %v498_v8 = vpack.c.bf16 %v467_v7, %v467_v7 }
  0xca   : > { %v567_v13 = vunpack.c.l.b16 %v471_v9 }
  0xcb   : > { %v534_v10 = vunpack.c.l.b16 %v498_v8  ;;  %v506_v11 = vsel %vm501_vm1, %v498_v8, 0 }
  0xcc   : > { %515 = vmatpush.bf16.xpose.msra.mxu2 %v506_v11  ;;  %v568_v16 = vpack.c.b16 %v567_v13, %v567_v13  ;;  %v694_v13 = vunpack.c.h.bf16 %v984_v33 }
  0xcd   : > { %v1434_v12 = vpack.c.b16 %v534_v10, %v534_v10  ;;  %v718_v10 = vld [vmem:[%s1446_s11] sm:$0x1] }
  0xce   : > { %v719_v11 = vunpack.c.l.bf16 %v718_v10 }
  0xcf   : > { %634 = vrot.lane.b32.xlu2 %v1434_v12, %s1231_s20  ;;  %571 = vrot.lane.b32.xlu1 %v1434_v12, %s1232_s16  ;;  %v437_v14 = vpop.f32.mrf.mxu0 }
  0xd0   : > { %v469_v15 = vpop.f32.mrf.mxu1  ;;  %v720_v14 = vperm.slane %v719_v11, 0 }
  0xd3   : > { %979 = vmatmul.msk.bf16.vlgmr.msra.gmra.mxu2 %vm501_vm1, %v471_v9 }
  0xd7   : > { %697 = vrot.lane.b32.xlu2 %v1434_v12, %s1233_s26  ;;  %569 = vrot.lane.b32.xlu1 %v568_v16, %s1232_s16 }
  0xdf   : > { %695 = vrot.lane.b32.xlu2 %v568_v16, %s1233_s26  ;;  %632 = vrot.lane.b32.xlu1 %v568_v16, %s1231_s20  ;;  %s846_s20 = sshll.u32 %s842_s15, 4  ;;  %s847_s20 = int_to_ptr.hbm [resolvable:$true] %s846_s20 }
  0xe0   : > { %s1173_s16 = sshra.s32 %s847_s20, 4  ;;  %s1174_s16 = int_to_ptr.hbm [resolvable:$true] %s1173_s16 }
  0xe1   : > { %s1175_s26 = scalar_lea.hbm %s1174_s16, 8  ;;  %p1180_p2 = scmp.lt.s32.totalorder %s1174_s16, %s1569_s9 }
  0xe2   : > { %p1176_p13 = scmp.ne.s32.totalorder %s1174_s16, %s1175_s26  ;;  %p1181_p9 = scmp.lt.s32.totalorder %s1179_s28, %s1175_s26 }
  0xe4   : > { %p1177_p3 = pnand %p1176_p13, %p1338_p11  ;;  %p1182_p0 = por %p1181_p9, %p1180_p2 }
  0xe6   : > { %p1178_p10 = pneg %p1177_p3 }
  0xe8   : > { %p1183_p1 = pnand %p1182_p0, %p1178_p10 }
 0x129   : > { %v635_v17 = vpop.permute.xlu2 %634 }
 0x12a   : > { %v640_v18 = vsel %vm501_vm1, %v635_v17, 0 }
 0x12b   : > { %649 = vmatpush.bf16.xpose.msrb.mxu1 %v640_v18 }
 0x131   : > { %v698_v48 = vpop.permute.xlu2 %697 }
 0x132   : > { %v703_v51 = vsel %vm501_vm1, %v698_v48, 0 }
 0x139   : > { %v696_v54 = vpop.permute.xlu2 %695 }
 0x141   : > { %v572_v19 = vpop.permute.xlu1 %571 }
 0x142   : > { %v577_v49 = vsel %vm501_vm1, %v572_v19, 0 }
 0x149   : > { %v570_v20 = vpop.permute.xlu1 %569 }
 0x151   : > { %v633_v23 = vpop.permute.xlu1 %632 }
 0x152   : > { %985 = vmatmul.msk.bf16.vlgmr.msrb.gmra.mxu1 %vm501_vm1, %v633_v23 }
 0x156   : > { %v517_v27 = vpop.f32.mrf.mxu2 }
 0x157   : > { %v518_v28 = vadd.f32 %v517_v27, %v500_v25 }
 0x159   : > { %v524_v29 = vadd.f32 %v523_v26, %v518_v28 }
 0x15b   : > { %v526_v30 = vsel %vm525_vm2, %v524_v29, -inf }
 0x15c   : > { %527 = vmax.xlane.f32.xlu0 %v526_v30 }
 0x15e   : > { %v519_v31 = vpop.f32.mrf.mxu2 }
 0x170   : > { %536 = vrot.lane.b32.xlu0 %v1434_v12, %s1234_s22 }
 0x178   : > { %603 = vrot.lane.b32.xlu0 %v1434_v12, %s1235_s17 }
 0x1cf   : > { %v651_v37 = vpop.f32.mrf.mxu1  ;;  %v528_v39 = vpop.xlane.xlu0 %527 }
 0x1d0   : > { %v652_v38 = vadd.f32 %v651_v37, %v631_v35  ;;  %v529_v41 = vsub.f32 %v524_v29, %v528_v39 }
 0x1d2   : > { %v658_v40 = vadd.f32 %v657_v36, %v652_v38  ;;  %v530_v44 = vmul.f32 1.442695, %v529_v41 }
 0x1d4   : > { %v659_v42 = vsel %vm525_vm2, %v658_v40, -inf  ;;  %1079 = vpow2.f32 %v530_v44 }
 0x1d5   : > { %660 = vmax.xlane.f32.xlu2 %v659_v42 }
 0x1d7   : > { %v653_v43 = vpop.f32.mrf.mxu1 }
 0x1da   : > { %v1466_v45 = vpop.eup %1079 }
 0x1db   : > { %v532_v50 = vpack.c.bf16 %v1466_v45, %v1466_v45  ;;  %v558_v32 = vsel %vm525_vm2, %v1466_v45, 0.0 }
 0x1e2   : > { %v537_v46 = vpop.permute.xlu0 %536 }
 0x1e3   : > { %v543_v47 = vsel %vm541_vm3, %v537_v46, 0 }
 0x1e4   : > { %552 = vmatpush.bf16.msra.mxu3 %v543_v47 }
 0x1e7   : > { %980 = vmatmul.msk.bf16.vlgmr.msra.gmra.mxu3 %vm525_vm2, %v532_v50 }
 0x1e8   : > { %586 = vmatpush.bf16.xpose.msrb.mxu3 %v577_v49 }
 0x1ea   : > { %v604_v52 = vpop.permute.xlu0 %603 }
 0x1eb   : > { %v609_v53 = vsel %vm541_vm3, %v604_v52, 0 }
 0x1ec   : > { %618 = vmatpush.bf16.msrb.mxu0 %v609_v53 }
 0x1ed   : > { %666 = vrot.lane.b32.xlu2 %v1434_v12, %s1236_s27 }
 0x1f0   : > { %712 = vmatpush.bf16.xpose.msra.mxu3 %v703_v51 }
 0x1f7   : > { %982 = vmatmul.msk.bf16.vlgmr.msrb.gmra.mxu3 %vm501_vm1, %v570_v20  ;;  %v1077_v20 = vld [vmem:[%s1566_s6] ss:$0 sm:$0xff] }
 0x207   : > { %988 = vmatmul.msk.bf16.vlgmr.msra.gmra.mxu3 %vm501_vm1, %v696_v54 }
 0x248   : > { %v661_v55 = vpop.xlane.xlu2 %660 }
 0x249   : > { %v662_v56 = vsub.f32 %v658_v40, %v661_v55 }
 0x24b   : > { %v663_v57 = vmul.f32 1.442695, %v662_v56 }
 0x24d   : > { %1081 = vpow2.f32 %v663_v57 }
 0x250   : > { %v667_v58 = vpop.permute.xlu2 %666 }
 0x251   : > { %v672_v59 = vsel %vm541_vm3, %v667_v58, 0 }
 0x252   : > { %681 = vmatpush.bf16.msrb.mxu2 %v672_v59 }
 0x253   : > { %v1082_v60 = vpop.eup %1081 }
 0x254   : > { %v665_v61 = vpack.c.bf16 %v1082_v60, %v1082_v60  ;;  %v687_v21 = vsel %vm525_vm2, %v1082_v60, 0.0 }
 0x256   : > { %986 = vmatmul.msk.bf16.vlgmr.msrb.gmra.mxu2 %vm525_vm2, %v665_v61 }
 0x26a   : > { %v1481_v62 = vpop.f32.mrf.mxu3 }
 0x272   : > { %v556_v63 = vpop.f32.mrf.mxu3 }
 0x27a   : > { %v588_v4 = vpop.f32.mrf.mxu3 }
 0x27b   : > { %v589_v5 = vadd.f32 %v588_v4, %v565_v2  ;;  %v1018_v2 = vld [vmem:[%s1567_s7 + $0x18] sm:$0xff]  ;;  %v1016_v4 = vld [vmem:[%s1567_s7 + $0x8] sm:$0xff] }
 0x27c   : > { %821 = vmatpush.bf16.msra.mxu1 %v1018_v2 }
 0x27d   : > { %v595_v7 = vadd.f32 %v594_v3, %v589_v5  ;;  %v1017_v3 = vld [vmem:[%s1567_s7 + $0x10] sm:$0xff]  ;;  %v1015_v5 = vld [vmem:[%s1567_s7] sm:$0xff] }
 0x27f   : > { %v596_v8 = vsel %vm525_vm2, %v595_v7, -inf }
 0x280   : > { %597 = vmax.xlane.f32.xlu1 %v596_v8  ;;  %822 = vmatpush.bf16.msra.mxu1 %v1017_v3 }
 0x282   : > { %v590_v9 = vpop.f32.mrf.mxu3 }
 0x284   : > { %823 = vmatpush.bf16.msra.mxu1 %v1016_v4 }
 0x288   : > { %824 = vmatpush.bf16.msra.mxu1 %v1015_v5 }
 0x28a   : > { %v714_v15 = vpop.f32.mrf.mxu3 }
 0x28b   : > { %v715_v16 = vadd.f32 %v714_v15, %v694_v13 }
 0x28d   : > { %v721_v17 = vadd.f32 %v720_v14, %v715_v16 }
 0x28f   : > { %v722_v18 = vsel %vm525_vm2, %v721_v17, -inf }
 0x290   : > { %723 = vmax.xlane.f32.xlu0 %v722_v18 }
 0x292   : > { %v716_v19 = vpop.f32.mrf.mxu3 }
 0x299   : > { %729 = vrot.lane.b32.xlu1 %v1434_v12, %s1237_s14 }
 0x2a4   : > { %475 = vrot.lane.b32.xlu0 %v1077_v20, %s1234_s22 }
 0x2c3   : > { %688 = vadd.xlane.f32.xlu1 %v687_v21 }
 0x2d9   : > { %v683_v22 = vpop.f32.mrf.mxu2 }
 0x2e1   : > { %v685_v23 = vpop.f32.mrf.mxu2 }
 0x2f3   : > { %v598_v24 = vpop.xlane.xlu1 %597 }
 0x2f4   : > { %v599_v25 = vsub.f32 %v595_v7, %v598_v24 }
 0x2f6   : > { %v600_v26 = vmul.f32 1.442695, %v599_v25 }
 0x2f8   : > { %1083 = vpow2.f32 %v600_v26 }
 0x2fe   : > { %v1084_v27 = vpop.eup %1083 }
 0x2ff   : > { %v624_v28 = vsel %vm525_vm2, %v1084_v27, 0.0  ;;  %v602_v29 = vpack.c.bf16 %v1084_v27, %v1084_v27 }
 0x300   : > { %625 = vadd.xlane.f32.xlu2 %v624_v28 }
 0x301   : > { %983 = vmatmul.msk.bf16.vlgmr.msrb.gmra.mxu0 %vm525_vm2, %v602_v29 }
 0x303   : > { %v724_v12 = vpop.xlane.xlu0 %723 }
 0x304   : > { %v725_v30 = vsub.f32 %v721_v17, %v724_v12 }
 0x306   : > { %v726_v31 = vmul.f32 1.442695, %v725_v30 }
 0x308   : > { %1085 = vpow2.f32 %v726_v31  ;;  %559 = vadd.xlane.f32.xlu2 %v558_v32 }
 0x30b   : > { %v730_v33 = vpop.permute.xlu1 %729 }
 0x30c   : > { %v735_v34 = vsel %vm541_vm3, %v730_v33, 0 }
 0x30d   : > { %744 = vmatpush.bf16.msra.mxu0 %v735_v34 }
 0x30e   : > { %v1086_v35 = vpop.eup %1085 }
 0x30f   : > { %v728_v36 = vpack.c.bf16 %v1086_v35, %v1086_v35  ;;  %v750_v37 = vsel %vm525_vm2, %v1086_v35, 0.0 }
 0x310   : > { %751 = vadd.xlane.f32.xlu0 %v750_v37 }
 0x311   : > { %989 = vmatmul.msk.bf16.vlgmr.msra.gmra.mxu0 %vm525_vm2, %v728_v36 }
 0x316   : > { %v476_v41 = vpop.permute.xlu0 %475 }
 0x317   : > { %v478_v42 = vadd.f32 %v476_v41, %v1429_v6 }
 0x319   : > { %v978_v43 = vmul.f32 -1.442695, %v478_v42 }
 0x336   : > { %v689_v38 = vpop.xlane.xlu1 %688 }
 0x337   : > { %1087 = vrcp.f32 %v689_v38 }
 0x338   : > { %1089 = vpow2.f32 %v978_v43 }
 0x33d   : > { %v1088_v39 = vpop.eup %1087 }
 0x33e   : > { %v691_v40 = vmul.f32 %v1088_v39, %v683_v22  ;;  %v1090_v44 = vpop.eup %1089 }
 0x33f   : > { %v482_v45 = vadd.f32 1.0, %v1090_v44 }
 0x340   : > { %760 = vrot.lane.b32.xlu2 %v691_v40, %s1236_s27 }
 0x341   : > { %1091 = vrcp.f32 %v482_v45  ;;  %v494_v55 = vand.u32 2147483648, %v482_v45  ;;  %vm488_vm5 = vweird.f32 %v482_v45  ;;  %v492_v6 = vand.u32 2147483647, %v482_v45 }
 0x343   : > { %v495_v59 = vor.u32 1.1754944e-38, %v494_v55  ;;  %vm493_vm7 = vcmp.eq.f32.partialorder %v492_v6, 8.507059e+37 }
 0x347   : > { %v1092_v46 = vpop.eup %1091 }
 0x348   : > { %v484_v48 = vmul.f32 %v1092_v46, %v482_v45  ;;  %vm489_vm4 = vweird.f32 %v1092_v46 }
 0x349   : > { %vm490_vm6 = vmor %vm488_vm5, %vm489_vm4 }
 0x34a   : > { %v485_v49 = vsub.f32 1.0, %v484_v48 }
 0x34c   : > { %v486_v50 = vmul.f32 %v1092_v46, %v485_v49 }
 0x34e   : > { %v487_v54 = vadd.f32 %v1092_v46, %v486_v50 }
 0x350   : > { %v491_v57 = vsel %vm490_vm6, %v1092_v46, %v487_v54 }
 0x351   : > { %v496_v60 = vsel %vm493_vm7, %v495_v59, %v491_v57 }
 0x373   : > { %v626_v47 = vpop.xlane.xlu2 %625 }
 0x374   : > { %1093 = vrcp.f32 %v626_v47 }
 0x37a   : > { %v1094_v51 = vpop.eup %1093 }
 0x37b   : > { %v560_v7 = vpop.xlane.xlu2 %559 }
 0x37e   : > { %v620_v52 = vpop.f32.mrf.mxu0 }
 0x37f   : > { %v628_v53 = vmul.f32 %v1094_v51, %v620_v52 }
 0x381   : > { %756 = vrot.lane.b32.xlu1 %v628_v53, %s1237_s14 }
 0x383   : > { %v752_v56 = vpop.xlane.xlu0 %751 }
 0x384   : > { %1095 = vrcp.f32 %v752_v56 }
 0x385   : > { %1097 = vrcp.f32 %v560_v7 }
 0x386   : > { %v622_v58 = vpop.f32.mrf.mxu0 }
 0x389   : > { %772 = vrot.lane.b32.xlu1 %v496_v60, %s1234_s22  ;;  %s959_s22 = sshll.u32 %s1402_s23, 3 }
 0x38a   : > { %v1096_v61 = vpop.eup %1095  ;;  %s399_s18 = scalar_lea.vmem [#allocation7], %s959_s22 }
 0x38b   : > { %v1098_v9 = vpop.eup %1097  ;;  %s844_s29 = sshll.u32 %s399_s18, 4  ;;  %s845_s29 = int_to_ptr.vmem [resolvable:$true] %s844_s29 }
 0x38c   : > { %v562_v10 = vmul.f32 %v1098_v9, %v1481_v62  ;;  %v1078_v62 = vld [vmem:[%s1568_s8] ss:$0 sm:$0xff] }
 0x38e   : > { %v746_v63 = vpop.f32.mrf.mxu0 }
 0x38f   : > { %v754_v0 = vmul.f32 %v1096_v61, %v746_v63 }
 0x391   : > { %764 = vrot.lane.b32.xlu0 %v754_v0, %s1235_s17 }
 0x396   : > { %v748_v1 = vpop.f32.mrf.mxu0 }
 0x39a   : > { %v761_v13 = vpop.permute.xlu2 %760 }
 0x3f3   : > { %v757_v8 = vpop.permute.xlu1 %756 }
 0x3f4   : > { %v767_v11 = vsel %vm501_vm1, %v562_v10, %v757_v8 }
 0x3f5   : > { %v768_v14 = vsel %vm422_vm0, %v767_v11, %v761_v13 }
 0x3fb   : > { %v773_v16 = vpop.permute.xlu1 %772 }
 0x403   : > { %v765_v15 = vpop.permute.xlu0 %764 }
 0x404   : > { %v770_v17 = vsel %vm769_vm8, %v768_v14, %v765_v15 }
 0x405   : > { %v775_v18 = vmul.f32 %v773_v16, %v770_v17 }
 0x407   : > { %v776_v19 = vpack.c.bf16 %v775_v18, %v775_v18 }
 0x409   : > { %1006 = vmatmul.msk.bf16.vlgmr.msra.gmra.mxu1 %vm813_vm9, %v776_v19 }
 0x486   : > { %v826_v20 = vpop.f32.mrf.mxu1 }
 0x487   : > { %v827_v21 = vadd.f32 %v1078_v62, %v826_v20 }
 0x489   : > { %830 = vst.msk [vmem:[%s399_s18] sm:$0xff] %vm422_vm0, %v827_v21 }
 0x48a   : > { %1186 = shalt.err (!%p1183_p1)
}
 0x48b   : > { %1023 = dma.vmem_to_hbm [thread:$0]  (%p1338_p11), %s845_s29, 128, %s847_s20, %s832_s13  }
 0x48e   : > { %v828_v22 = vpop.f32.mrf.mxu1 }
 0x48f PF: > { %s1588_s23 = sld [smem:[#allocation11_spill]]  ;;  %p1590_p4 = scmp.ge.s32.totalorder %s1229_s12, 2 }
 0x491   : > { %p1033_p7 = pnand %p1590_p4, %p1342_p12 }
 0x493   : > { %p1034_p5 = pneg %p1033_p7 }
 0x495   : > { %s858_s22 = sand.u32 1, %s1588_s23  }
 0x496   : > { %s859_s17 = scalar_lea.sflag [#allocation4], %s858_s22 }
 0x497   : > { %1212 = dma.done.wait (%p1034_p5), %s859_s17, 128  }
 0x498   : > { %1214 = vsyncadd (%p1034_p5), %s859_s17, 4294967168  ;;  %s1591_s12 = sld [smem:[#allocation13_spill]]  ;;  %s1594_s30 = smov %s1221_s10 }
 0x499   : > { %s1592_s19 = sld [smem:[#allocation12_spill]] }
 0x49a   : > { %s1593_s11 = sld [smem:[#allocation14_spill]] }
 0x49e   : > { %p25_p8 = scmp.ge.s32.totalorder %s1591_s12, 4  }
 0x49f   : > { %s1595_s10 = smov %s1592_s19 }
 0x4a0   :  { %27 = sbr.rel (!%p25_p8) target bundleno = 9 (0x9), region = 120 }
 0x4a5   :  { %865 = vsyncpa [#allocation3], 1 }
 0x4a6   :  { %867 = vsyncpa [#allocation3 + $0x1], 1 }
 0x4a7   :  { %868 = vsyncpa [#allocation6], 1 }
 0x4a8   :  { %870 = vsyncpa [#allocation6 + $0x1], 1 }
 0x4a9   :  { %871 = vsyncpa [#allocation4], 1 }
 0x4aa   :  { %873 = vsyncpa [#allocation4 + $0x1], 1 }

</bundles_post_ra>
